<compile_context>
chip_gen: v7x
topology: tpu7x:2x2x1
jax: 0.10.0
libtpu: 0.0.40
codegen_flags: <defaults>
</compile_context>

<pallas_src>
import math

import jax
import jax.numpy as jnp
from jax.experimental import pallas as pl
from jax.experimental.pallas import tpu as pltpu


class Config:
    base_chan = 4
    out_chan = 3


_LANES = 128


def _round_up(x, m):
    return ((x + m - 1) // m) * m


def _conv1x1_kernel(x_ref, w_ref, b_ref, o_ref):
    # x_ref: (Cin, S, 128)  VMEM tile  -- spatial fills sublanes AND lanes
    # w_ref: (Cout, Cin)    SMEM scalars
    # b_ref: (Cout,)        SMEM scalars
    # o_ref: (Cout, S, 128) VMEM tile
    cin = x_ref.shape[0]
    cout = o_ref.shape[0]

    # One dense load, one (possibly no-op) cast, hoisted out of the FMA loops.
    x = x_ref[...].astype(jnp.float32)                # (Cin, S, 128)

    for co in range(cout):                            # static unroll: 12 VPU FMAs
        acc = w_ref[co, 0] * x[0] + b_ref[co]         # bias folded into 1st term
        for ci in range(1, cin):
            acc = acc + w_ref[co, ci] * x[ci]
        o_ref[co] = acc.astype(o_ref.dtype)           # direct dense (S,128) store


def _pick_tiling(hw, max_rows):
    """Split hw into R rows of 128 lanes; pick a row tile S (multiple of 8 or
    equal to the full row extent) that divides the (possibly padded) R."""
    rows = -(-hw // _LANES)                 # ceil(hw / 128)
    if rows <= max_rows:
        # One tile covers the whole spatial extent of a batch element; block
        # dim == full array dim, so no multiple-of-8 requirement.
        return rows, rows
    # Large image: round rows up to a multiple of 128 so a power-of-two row
    # tile in {1024, 512, 256, 128} is guaranteed to divide it exactly.
    rows_pad = _round_up(rows, _LANES)
    s = max_rows
    while rows_pad % s:
        s //= 2
    return rows_pad, s


def segmentation_head_forward(x_nchw, weight, bias, *, max_tile_rows=1024):
    """1x1 conv (pointwise), equivalent to nn.Conv2d(base_chan, out_chan, 1).

    x_nchw : (N, Cin, H, W)
    weight : (Cout, Cin, 1, 1)   -- PyTorch layout
    bias   : (Cout,)
    returns: (N, Cout, H, W)
    """
    n, cin, h, w_sp = x_nchw.shape
    cout = weight.shape[0]
    hw = h * w_sp

    w_mat = weight.reshape(cout, cin).astype(jnp.float32)   # -> SMEM
    b_vec = bias.reshape(cout).astype(jnp.float32)          # -> SMEM

    rows_pad, s_rows = _pick_tiling(hw, max_tile_rows)
    hw_pad = rows_pad * _LANES

    # Free reshape: NCHW is contiguous as (N, Cin, H*W).
    x_flat = x_nchw.reshape(n, cin, hw)
    if hw_pad != hw:
        # Tiny pad (<128 elems per channel for small images, <~2% for large).
        # TODO(synk): replace with an in-kernel tail mask (cdiv grid + masked
        # store) to avoid even this extra pass when H*W % 128 != 0.
        x_flat = jnp.pad(x_flat, ((0, 0), (0, 0), (0, hw_pad - hw)))
    x_blk = x_flat.reshape(n, cin, rows_pad, _LANES)

    grid = (n, rows_pad // s_rows)

    out_blk = pl.pallas_call(
        _conv1x1_kernel,
        out_shape=jax.ShapeDtypeStruct((n, cout, rows_pad, _LANES), x_nchw.dtype),
        grid=grid,
        in_specs=[
            # x: one batch element, all Cin channels, one (S, 128) spatial slab
            pl.BlockSpec((None, cin, s_rows, _LANES), lambda b, t: (b, 0, t, 0)),
            # tiny weight / bias stay resident in SMEM, read as scalars
            pl.BlockSpec(memory_space=pltpu.MemorySpace.SMEM),
            pl.BlockSpec(memory_space=pltpu.MemorySpace.SMEM),
        ],
        out_specs=pl.BlockSpec(
            (None, cout, s_rows, _LANES), lambda b, t: (b, 0, t, 0)
        ),
        compiler_params=pltpu.CompilerParams(
            dimension_semantics=("parallel", "parallel"),
        ),
    )(x_blk, w_mat, b_vec)

    out_flat = out_blk.reshape(n, cout, hw_pad)
    if hw_pad != hw:
        out_flat = out_flat[:, :, :hw]
    return out_flat.reshape(n, cout, h, w_sp)


def init_params(key, cin, cout):
    # Deterministic init mimicking PyTorch Conv2d default (kaiming uniform +
    # uniform bias in +-1/sqrt(fan_in)).
    kw, kb = jax.random.split(key)
    fan_in = cin * 1 * 1
    bound_w = math.sqrt(1.0 / fan_in) * math.sqrt(3.0)
    weight = jax.random.uniform(
        kw, (cout, cin, 1, 1), dtype=jnp.float32, minval=-bound_w, maxval=bound_w
    )
    bound_b = 1.0 / math.sqrt(fan_in)
    bias = jax.random.uniform(
        kb, (cout,), dtype=jnp.float32, minval=-bound_b, maxval=bound_b
    )
    return weight, bias


if __name__ == "__main__":
    cfg = Config()
    key = jax.random.PRNGKey(0)
    kx, kp = jax.random.split(key)

    # small shapes: batch=2, base_chan=4, spatial=16x16
    x = jax.random.normal(kx, (2, cfg.base_chan, 16, 16), dtype=jnp.float32)
    weight, bias = init_params(kp, cfg.base_chan, cfg.out_chan)

    out = segmentation_head_forward(x, weight, bias)
    out = jax.block_until_ready(out)

    # sanity check against plain-JAX reference (einsum 1x1 conv)
    ref = jnp.einsum("nchw,oc->nohw", x, weight.reshape(cfg.out_chan, cfg.base_chan))
    ref = ref + bias.reshape(1, cfg.out_chan, 1, 1)
    assert out.shape == (2, cfg.out_chan, 16, 16)
    assert jnp.allclose(out, ref, atol=1e-5, rtol=1e-5)

    print("KERNEL_OK")
</pallas_src>

<mosaic_0001>
module attributes {stable_mosaic.version = 11 : i64} {
  func.func @_conv1x1_kernel(%arg0: i32, %arg1: i32, %arg2: memref<1x4x2x128xf32, #tpu.memory_space<vmem>>, %arg3: memref<3x4xf32, #tpu.memory_space<smem>>, %arg4: memref<3xf32, #tpu.memory_space<smem>>, %arg5: memref<1x3x2x128xf32, #tpu.memory_space<vmem>>) attributes {dimension_semantics = [#tpu.dimension_semantics<parallel>, #tpu.dimension_semantics<parallel>], iteration_bounds = array<i64: 2, 1>, scalar_prefetch = 0 : i64, scratch_operands = 0 : i64, tpu.core_type = #tpu.core_type<tc>, window_params = [{transform_indices = @transform_0, window_bounds = array<i64: 1, 4, 2, 128>}, {transform_indices = @transform_1, window_bounds = array<i64: 3, 4>}, {transform_indices = @transform_2, window_bounds = array<i64: 3>}, {transform_indices = @transform_3, window_bounds = array<i64: 1, 3, 2, 128>}]} {
    %c0 = arith.constant 0 : index
    %c0_0 = arith.constant 0 : index
    %c0_1 = arith.constant 0 : index
    %c0_2 = arith.constant 0 : index
    %0 = vector.load %arg2[%c0, %c0_0, %c0_1, %c0_2] : memref<1x4x2x128xf32, #tpu.memory_space<vmem>>, vector<1x4x2x128xf32>
    %1 = vector.shape_cast %0 : vector<1x4x2x128xf32> to vector<4x2x128xf32>
    %c0_3 = arith.constant 0 : index
    %c0_4 = arith.constant 0 : index
    %2 = memref.load %arg3[%c0_3, %c0_4] : memref<3x4xf32, #tpu.memory_space<smem>>
    %3 = vector.extract_strided_slice %1 {offsets = [0, 0, 0], sizes = [1, 2, 128], strides = [1, 1, 1]} : vector<4x2x128xf32> to vector<1x2x128xf32>
    %4 = vector.shape_cast %3 : vector<1x2x128xf32> to vector<2x128xf32>
    %5 = vector.broadcast %2 : f32 to vector<2x128xf32>
    %6 = arith.mulf %5, %4 : vector<2x128xf32>
    %c0_5 = arith.constant 0 : index
    %7 = memref.load %arg4[%c0_5] : memref<3xf32, #tpu.memory_space<smem>>
    %8 = vector.broadcast %7 : f32 to vector<2x128xf32>
    %9 = arith.addf %6, %8 : vector<2x128xf32>
    %c0_6 = arith.constant 0 : index
    %c1 = arith.constant 1 : index
    %10 = memref.load %arg3[%c0_6, %c1] : memref<3x4xf32, #tpu.memory_space<smem>>
    %11 = vector.extract_strided_slice %1 {offsets = [1, 0, 0], sizes = [1, 2, 128], strides = [1, 1, 1]} : vector<4x2x128xf32> to vector<1x2x128xf32>
    %12 = vector.shape_cast %11 : vector<1x2x128xf32> to vector<2x128xf32>
    %13 = vector.broadcast %10 : f32 to vector<2x128xf32>
    %14 = arith.mulf %13, %12 : vector<2x128xf32>
    %15 = arith.addf %9, %14 : vector<2x128xf32>
    %c0_7 = arith.constant 0 : index
    %c2 = arith.constant 2 : index
    %16 = memref.load %arg3[%c0_7, %c2] : memref<3x4xf32, #tpu.memory_space<smem>>
    %17 = vector.extract_strided_slice %1 {offsets = [2, 0, 0], sizes = [1, 2, 128], strides = [1, 1, 1]} : vector<4x2x128xf32> to vector<1x2x128xf32>
    %18 = vector.shape_cast %17 : vector<1x2x128xf32> to vector<2x128xf32>
    %19 = vector.broadcast %16 : f32 to vector<2x128xf32>
    %20 = arith.mulf %19, %18 : vector<2x128xf32>
    %21 = arith.addf %15, %20 : vector<2x128xf32>
    %c0_8 = arith.constant 0 : index
    %c3 = arith.constant 3 : index
    %22 = memref.load %arg3[%c0_8, %c3] : memref<3x4xf32, #tpu.memory_space<smem>>
    %23 = vector.extract_strided_slice %1 {offsets = [3, 0, 0], sizes = [1, 2, 128], strides = [1, 1, 1]} : vector<4x2x128xf32> to vector<1x2x128xf32>
    %24 = vector.shape_cast %23 : vector<1x2x128xf32> to vector<2x128xf32>
    %25 = vector.broadcast %22 : f32 to vector<2x128xf32>
    %26 = arith.mulf %25, %24 : vector<2x128xf32>
    %27 = arith.addf %21, %26 : vector<2x128xf32>
    %c0_9 = arith.constant 0 : index
    %c0_10 = arith.constant 0 : index
    %c0_11 = arith.constant 0 : index
    %c0_12 = arith.constant 0 : index
    %28 = vector.load %arg5[%c0_9, %c0_10, %c0_11, %c0_12] : memref<1x3x2x128xf32, #tpu.memory_space<vmem>>, vector<1x1x2x128xf32>
    %29 = vector.shape_cast %28 : vector<1x1x2x128xf32> to vector<2x128xf32>
    %30 = vector.shape_cast %27 : vector<2x128xf32> to vector<1x1x2x128xf32>
    tpu.vector_store %arg5[%c0_9, %c0_10, %c0_11, %c0_12], %30 {strides = array<i32>} : memref<1x3x2x128xf32, #tpu.memory_space<vmem>>, vector<1x1x2x128xf32>,
    %c1_13 = arith.constant 1 : index
    %c0_14 = arith.constant 0 : index
    %31 = memref.load %arg3[%c1_13, %c0_14] : memref<3x4xf32, #tpu.memory_space<smem>>
    %32 = vector.extract_strided_slice %1 {offsets = [0, 0, 0], sizes = [1, 2, 128], strides = [1, 1, 1]} : vector<4x2x128xf32> to vector<1x2x128xf32>
    %33 = vector.shape_cast %32 : vector<1x2x128xf32> to vector<2x128xf32>
    %34 = vector.broadcast %31 : f32 to vector<2x128xf32>
    %35 = arith.mulf %34, %33 : vector<2x128xf32>
    %c1_15 = arith.constant 1 : index
    %36 = memref.load %arg4[%c1_15] : memref<3xf32, #tpu.memory_space<smem>>
    %37 = vector.broadcast %36 : f32 to vector<2x128xf32>
    %38 = arith.addf %35, %37 : vector<2x128xf32>
    %c1_16 = arith.constant 1 : index
    %c1_17 = arith.constant 1 : index
    %39 = memref.load %arg3[%c1_16, %c1_17] : memref<3x4xf32, #tpu.memory_space<smem>>
    %40 = vector.extract_strided_slice %1 {offsets = [1, 0, 0], sizes = [1, 2, 128], strides = [1, 1, 1]} : vector<4x2x128xf32> to vector<1x2x128xf32>
    %41 = vector.shape_cast %40 : vector<1x2x128xf32> to vector<2x128xf32>
    %42 = vector.broadcast %39 : f32 to vector<2x128xf32>
    %43 = arith.mulf %42, %41 : vector<2x128xf32>
    %44 = arith.addf %38, %43 : vector<2x128xf32>
    %c1_18 = arith.constant 1 : index
    %c2_19 = arith.constant 2 : index
    %45 = memref.load %arg3[%c1_18, %c2_19] : memref<3x4xf32, #tpu.memory_space<smem>>
    %46 = vector.extract_strided_slice %1 {offsets = [2, 0, 0], sizes = [1, 2, 128], strides = [1, 1, 1]} : vector<4x2x128xf32> to vector<1x2x128xf32>
    %47 = vector.shape_cast %46 : vector<1x2x128xf32> to vector<2x128xf32>
    %48 = vector.broadcast %45 : f32 to vector<2x128xf32>
    %49 = arith.mulf %48, %47 : vector<2x128xf32>
    %50 = arith.addf %44, %49 : vector<2x128xf32>
    %c1_20 = arith.constant 1 : index
    %c3_21 = arith.constant 3 : index
    %51 = memref.load %arg3[%c1_20, %c3_21] : memref<3x4xf32, #tpu.memory_space<smem>>
    %52 = vector.extract_strided_slice %1 {offsets = [3, 0, 0], sizes = [1, 2, 128], strides = [1, 1, 1]} : vector<4x2x128xf32> to vector<1x2x128xf32>
    %53 = vector.shape_cast %52 : vector<1x2x128xf32> to vector<2x128xf32>
    %54 = vector.broadcast %51 : f32 to vector<2x128xf32>
    %55 = arith.mulf %54, %53 : vector<2x128xf32>
    %56 = arith.addf %50, %55 : vector<2x128xf32>
    %c0_22 = arith.constant 0 : index
    %c1_23 = arith.constant 1 : index
    %c0_24 = arith.constant 0 : index
    %c0_25 = arith.constant 0 : index
    %57 = vector.load %arg5[%c0_22, %c1_23, %c0_24, %c0_25] : memref<1x3x2x128xf32, #tpu.memory_space<vmem>>, vector<1x1x2x128xf32>
    %58 = vector.shape_cast %57 : vector<1x1x2x128xf32> to vector<2x128xf32>
    %59 = vector.shape_cast %56 : vector<2x128xf32> to vector<1x1x2x128xf32>
    tpu.vector_store %arg5[%c0_22, %c1_23, %c0_24, %c0_25], %59 {strides = array<i32>} : memref<1x3x2x128xf32, #tpu.memory_space<vmem>>, vector<1x1x2x128xf32>,
    %c2_26 = arith.constant 2 : index
    %c0_27 = arith.constant 0 : index
    %60 = memref.load %arg3[%c2_26, %c0_27] : memref<3x4xf32, #tpu.memory_space<smem>>
    %61 = vector.extract_strided_slice %1 {offsets = [0, 0, 0], sizes = [1, 2, 128], strides = [1, 1, 1]} : vector<4x2x128xf32> to vector<1x2x128xf32>
    %62 = vector.shape_cast %61 : vector<1x2x128xf32> to vector<2x128xf32>
    %63 = vector.broadcast %60 : f32 to vector<2x128xf32>
    %64 = arith.mulf %63, %62 : vector<2x128xf32>
    %c2_28 = arith.constant 2 : index
    %65 = memref.load %arg4[%c2_28] : memref<3xf32, #tpu.memory_space<smem>>
    %66 = vector.broadcast %65 : f32 to vector<2x128xf32>
    %67 = arith.addf %64, %66 : vector<2x128xf32>
    %c2_29 = arith.constant 2 : index
    %c1_30 = arith.constant 1 : index
    %68 = memref.load %arg3[%c2_29, %c1_30] : memref<3x4xf32, #tpu.memory_space<smem>>
    %69 = vector.extract_strided_slice %1 {offsets = [1, 0, 0], sizes = [1, 2, 128], strides = [1, 1, 1]} : vector<4x2x128xf32> to vector<1x2x128xf32>
    %70 = vector.shape_cast %69 : vector<1x2x128xf32> to vector<2x128xf32>
    %71 = vector.broadcast %68 : f32 to vector<2x128xf32>
    %72 = arith.mulf %71, %70 : vector<2x128xf32>
    %73 = arith.addf %67, %72 : vector<2x128xf32>
    %c2_31 = arith.constant 2 : index
    %c2_32 = arith.constant 2 : index
    %74 = memref.load %arg3[%c2_31, %c2_32] : memref<3x4xf32, #tpu.memory_space<smem>>
    %75 = vector.extract_strided_slice %1 {offsets = [2, 0, 0], sizes = [1, 2, 128], strides = [1, 1, 1]} : vector<4x2x128xf32> to vector<1x2x128xf32>
    %76 = vector.shape_cast %75 : vector<1x2x128xf32> to vector<2x128xf32>
    %77 = vector.broadcast %74 : f32 to vector<2x128xf32>
    %78 = arith.mulf %77, %76 : vector<2x128xf32>
    %79 = arith.addf %73, %78 : vector<2x128xf32>
    %c2_33 = arith.constant 2 : index
    %c3_34 = arith.constant 3 : index
    %80 = memref.load %arg3[%c2_33, %c3_34] : memref<3x4xf32, #tpu.memory_space<smem>>
    %81 = vector.extract_strided_slice %1 {offsets = [3, 0, 0], sizes = [1, 2, 128], strides = [1, 1, 1]} : vector<4x2x128xf32> to vector<1x2x128xf32>
    %82 = vector.shape_cast %81 : vector<1x2x128xf32> to vector<2x128xf32>
    %83 = vector.broadcast %80 : f32 to vector<2x128xf32>
    %84 = arith.mulf %83, %82 : vector<2x128xf32>
    %85 = arith.addf %79, %84 : vector<2x128xf32>
    %c0_35 = arith.constant 0 : index
    %c2_36 = arith.constant 2 : index
    %c0_37 = arith.constant 0 : index
    %c0_38 = arith.constant 0 : index
    %86 = vector.load %arg5[%c0_35, %c2_36, %c0_37, %c0_38] : memref<1x3x2x128xf32, #tpu.memory_space<vmem>>, vector<1x1x2x128xf32>
    %87 = vector.shape_cast %86 : vector<1x1x2x128xf32> to vector<2x128xf32>
    %88 = vector.shape_cast %85 : vector<2x128xf32> to vector<1x1x2x128xf32>
    tpu.vector_store %arg5[%c0_35, %c2_36, %c0_37, %c0_38], %88 {strides = array<i32>} : memref<1x3x2x128xf32, #tpu.memory_space<vmem>>, vector<1x1x2x128xf32>,
    return
  }
  func.func @transform_0(%arg0: i32, %arg1: i32) -> (i32, i32, i32, i32) {
    %c0_i32 = arith.constant 0 : i32
    %c0_i32_0 = arith.constant 0 : i32
    %c0_i32_1 = arith.constant 0 : i32
    return %arg0, %c0_i32, %arg1, %c0_i32_0 : i32, i32, i32, i32
  }
  func.func @transform_1(%arg0: i32, %arg1: i32) -> (i32, i32) {
    %c0_i32 = arith.constant 0 : i32
    %c0_i32_0 = arith.constant 0 : i32
    %c0_i32_1 = arith.constant 0 : i32
    return %c0_i32, %c0_i32_0 : i32, i32
  }
  func.func @transform_2(%arg0: i32, %arg1: i32) -> i32 {
    %c0_i32 = arith.constant 0 : i32
    %c0_i32_0 = arith.constant 0 : i32
    return %c0_i32 : i32
  }
  func.func @transform_3(%arg0: i32, %arg1: i32) -> (i32, i32, i32, i32) {
    %c0_i32 = arith.constant 0 : i32
    %c0_i32_0 = arith.constant 0 : i32
    %c0_i32_1 = arith.constant 0 : i32
    return %arg0, %c0_i32, %arg1, %c0_i32_0 : i32, i32, i32, i32
  }
}

</mosaic_0001>

<bundles_post_ra>
// kernel: tpu_custom_call.1
= control target key start
LH: loop header
LB: loop body
LE: loop exit
PB: predicated region body
PF: predicated region fallthrough
CT: control target
= control target key end

     0   :  { %8 = vsyncpa [#allocation3], 0  ;;  %s955_s0 = inlined_call_operand.hbm [shape: f32[2,4,2,128], index: 0, kind: input, shape index: {}]   ;;  %s956_s1 = inlined_call_operand.hbm [shape: f32[3,4], index: 1, kind: input, shape index: {}]   ;;  %s957_s2 = inlined_call_operand.vmem [shape: f32[3], index: 2, kind: input, shape index: {}]   ;;  %s958_s3 = inlined_call_operand.hbm [shape: f32[2,3,2,128], index: 3, kind: output, shape index: {}]  }
   0x1   :  { %10 = vsyncpa [#allocation3 + $0x1], 0 }
   0x2   :  { %11 = vsyncpa [#allocation5], 0 }
   0x3   :  { %12 = vsyncpa [#allocation6], 0 }
   0x4   :  { %13 = vsyncpa [#allocation4], 0 }
   0x5   :  { %15 = vsyncpa [#allocation4 + $0x1], 0  ;;  %s717_s12 = smov 0   ;;  %s719_s13 = smov 0  }
   0x6   :  { %s721_s14 = smov 0   ;;  %s723_s15 = smov 0  }
   0x7   :  { %s725_s16 = smov 0   ;;  %s727_s17 = smov 0  }
   0x8 LB: > { %s418_s18 = sadd.s32 4294967295, %s687_s17   ;;  %s419_s19 = sadd.s32 4294967294, %s687_s17   ;;  %s687_s17 = sphi %s727_s17, %s21_s17   ;;  %s683_s16 = sphi %s725_s16, %s979_s16   ;;  %s679_s15 = sphi %s723_s15, %s978_s15   ;;  %s675_s14 = sphi %s721_s14, %s977_s14   ;;  %s671_s13 = sphi %s719_s13, %s976_s13   ;;  %s667_s12 = sphi %s717_s12, %s975_s12  }
   0x9   : > { %s42_s20 = sadd.s32 1, %s675_s14  ;;  %p49_p0 = scmp.ne.s32.totalorder %s675_s14, %s671_s13 }
   0xa   : > { %p50_p1 = scmp.eq.s32.totalorder %s687_s17, 0  ;;  %p55_p2 = scmp.ne.s32.totalorder %s671_s13, %s667_s12 }
   0xb   : > { %p755_p3 = scmp.eq.s32.totalorder %s418_s18, 0  ;;  %p123_p4 = scmp.eq.s32.totalorder %s418_s18, 1 }
   0xc   : > { %p51_p5 = por %p50_p1, %p49_p0  ;;  %p129_p6 = scmp.eq.s32.totalorder %s419_s19, 1 }
   0xd   : > { %s963_s21 = scalar_select %p755_p3, 1, 0 }
   0xe   : > { %p761_p7 = por %p755_p3, %p55_p2  ;;  %p765_p8 = por %p123_p4, %p49_p0 }
   0xf   : > { %p769_p9 = por %p129_p6, %p55_p2  ;;  %p420_p10 = scmp.ge.s32.totalorder %s687_s17, 1 }
  0x10   : > { %s964_s22 = scalar_select %p761_p7, 1, 0 }
  0x11   : > { %s965_s23 = scalar_select %p765_p8, 1, 0 }
  0x12   : > { %s966_s24 = scalar_select %p769_p9, 1, 0 }
  0x13   : > { %p136_p11 = scmp.lt.s32.totalorder %s687_s17, 3  ;;  %p481_p1 = scmp.lt.s32.totalorder %s687_s17, 2 }
  0x14   : > { %s158_s28 = sshll.u32 %s957_s2, 4  ;;  %s169_s4 = sand.u32 1, %s675_s14   ;;  %s159_s28 = int_to_ptr.vmem [resolvable:$true] %s158_s28 }
  0x15   : > { %p776_p13 = pnand %p420_p10, %p136_p11  ;;  %p786_p4 = pnand %p481_p1, %p51_p5 }
  0x16   : > { %s33_s5 = sadd.s32 1, %s683_s16  ;;  %s539_s8 = scalar_lea.hbm %s956_s1, 64 }
  0x17   : > { %p464_p0 = pneg %p776_p13  ;;  %p540_p5 = scmp.ne.s32.totalorder %s956_s1, %s539_s8 }
  0x18   : > { %p546_p1 = scmp.lt.u32.totalorder %s539_s8, %s956_s1 }
  0x19   : > { %p792_p2 = pnand %p464_p0, %p755_p3 }
  0x1b   : > { %p541_p6 = pneg %p792_p2 }
  0x1d   : > { %p542_p10 = pnand %p541_p6, %p540_p5 }
  0x1f   : > { %p543_p11 = pneg %p542_p10 }
  0x21   : > { %p548_p0 = pnand %p546_p1, %p543_p11 }
  0x23   : > { %551 = shalt.err (!%p548_p0)
}
  0x24   : > { %s689_s19 = smov [#allocation7]   ;;  %s552_s6 = scalar_lea.vmem %s159_s28, 16 }
  0x25   : > { %467 = dma.hbm_to_smem (!%p792_p2), %s956_s1, 64, %s689_s19, [#allocation5]  }
  0x26   : > { %p553_p12 = scmp.ne.s32.totalorder %s159_s28, %s552_s6  ;;  %p560_p3 = scmp.lt.s32.totalorder %s159_s28, %s159_s28 }
  0x27   : > { %p561_p5 = scmp.lt.s32.totalorder %s552_s6, %s552_s6 }
  0x28   : > { %p555_p9 = pnand %p553_p12, %p541_p6 }
  0x29   : > { %p562_p10 = por %p561_p5, %p560_p3 }
  0x2a   : > { %p556_p8 = pneg %p555_p9 }
  0x2c   : > { %p563_p7 = pnand %p562_p10, %p556_p8 }
  0x2e   : > { %566 = shalt.err (!%p563_p7)
}
  0x2f   : > { %s690_s7 = smov [#allocation8]   ;;  %p35_p11 = scmp.ge.s32.totalorder %s33_s5, 2 }
  0x30   : > { %470 = dma.vmem_to_smem (!%p792_p2), %s159_s28, 16, %s690_s7, [#allocation6]  }
  0x31   : > { %s424_s8 = sshll.u32 %s169_s4, 3  ;;  %s449_s9 = sshll.u32 %s683_s16, 7 }
  0x32   : > { %s981_s5 = smov (%p35_p11, %s33_s5), 0  ;;  %s824_s30 = scalar_lea.hbm %s955_s0, %s449_s9 }
  0x33   : > { %s37_s18 = ssub.s32 %s683_s16, %s981_s5  ;;  %s173_s19 = scalar_lea.vmem [#allocation2], %s424_s8 }
  0x34   : > { %s181_s28 = sshll.u32 %s173_s19, 4  ;;  %p40_p3 = scmp.eq.s32.totalorder %s37_s18, 0  ;;  %s828_s28 = int_to_ptr.vmem [resolvable:$true] %s181_s28 }
  0x35   : > { %s837_s27 = scalar_lea.sflag [#allocation3], %s169_s4  ;;  %s567_s6 = scalar_lea.hbm %s824_s30, 128 }
  0x36   : > { %s833_s26 = scalar_select %p40_p3, %s675_s14, %s42_s20  }
  0x37   : > { %p568_p7 = scmp.ne.s32.totalorder %s824_s30, %s567_s6  ;;  %p569_p8 = pneg %p786_p4 }
  0x38   : > { %s572_s9 = scalar_lea.hbm %s955_s0, 256  ;;  %p573_p2 = scmp.lt.u32.totalorder %s824_s30, %s955_s0 }
  0x39   : > { %p570_p9 = pnand %p569_p8, %p568_p7  ;;  %p574_p6 = scmp.lt.u32.totalorder %s572_s9, %s567_s6 }
  0x3a   : > { %p576_p0 = scmp.lt.u32.totalorder %s567_s6, %s824_s30 }
  0x3b   : > { %p571_p12 = pneg %p570_p9  ;;  %p575_p1 = por %p574_p6, %p573_p2 }
  0x3d   : > { %p577_p5 = por %p576_p0, %p575_p1 }
  0x3f   : > { %p578_p10 = pnand %p577_p5, %p571_p12 }
  0x41   : > { %581 = shalt.err (!%p578_p10)
}
  0x42   : > { %s582_s20 = scalar_lea.vmem %s828_s28, 128  ;;  %s691_s4 = smov [#allocation2]  }
  0x43   : > { %p583_p11 = scmp.ne.s32.totalorder %s828_s28, %s582_s20  ;;  %s587_s18 = sshll.u32 %s691_s4, 4  ;;  %s588_s18 = int_to_ptr.vmem [resolvable:$false] %s587_s18 }
  0x44   : > { %s589_s19 = scalar_lea.vmem %s588_s18, 256  ;;  %p590_p9 = scmp.lt.s32.totalorder %s828_s28, %s588_s18 }
  0x45   : > { %p585_p3 = pnand %p583_p11, %p569_p8  ;;  %p591_p2 = scmp.lt.s32.totalorder %s589_s19, %s582_s20 }
  0x47   : > { %p586_p7 = pneg %p585_p3  ;;  %p592_p6 = por %p591_p2, %p590_p9 }
  0x49   : > { %p593_p1 = pnand %p592_p6, %p586_p7 }
  0x4b   : > { %596 = shalt.err (!%p593_p1)
}
  0x4c   : > { %s692_s6 = smov 32   ;;  %s693_s7 = smov 2  }
  0x4d   : > { %474 = dma.hbm_to_vmem [thread:$0]  (!%p786_p4), %s824_s30, 128, %s828_s28, %s837_s27, %s692_s6, %s692_s6, %s693_s7  }
  0x4e   : > { %193 = sbr.rel (%p776_p13) target bundleno = 131 (0x83), region = 32  ;;  %s868_s8 = sand.u32 (!%p776_p13), 1, %s671_s13  }
  0x4f   : > { %s428_s9 = sshll.u32 (!%p776_p13), %s868_s8, 3  ;;  %s196_s10 = scalar_lea.sflag (!%p776_p13), [#allocation3], %s868_s8 }
  0x50   : > { %s199_s11 = scalar_lea.vmem (!%p776_p13), [#allocation2], %s428_s9  ;;  %p970_p8 = scmp.ne.s32.totalorder (!%p776_p13), %s964_s22, 0 }
  0x55   : > { %650 = dma.done.wait (%p970_p8), %s196_s10, 128  }
  0x56   : > { %652 = vsyncadd (%p970_p8), %s196_s10, 4294967168  ;;  %p971_p12 = scmp.ne.s32.totalorder %s963_s21, 0 }
  0x58   : > { %654 = dma.done.wait (%p971_p12), [#allocation5], 64  }
  0x59   : > { %656 = vsyncadd (%p971_p12), [#allocation5], 4294967232 }
  0x5a   : > { %658 = dma.done.wait (%p971_p12), [#allocation6], 16  }
  0x5b   : > { %660 = vsyncadd (%p971_p12), [#allocation6], 4294967280 }
  0x5c   : > { %212 = sfence }
  0x5d   : > { %s235_s25 = sld [smem:[#allocation7]]  ;;  %s431_s30 = sld [smem:[#allocation7 + $0x1]]  ;;  %v231_v0 = vld [vmem:[%s199_s11] sm:$0x3]  ;;  %v232_v1 = vld [vmem:[%s199_s11 + $0x2] sm:$0x3] }
  0x5e   : > { %s238_s29 = sld [smem:[#allocation8]]  ;;  %s432_s28 = sld [smem:[#allocation7 + $0x2]]  ;;  %v233_v2 = vld [vmem:[%s199_s11 + $0x4] sm:$0x3]  ;;  %v234_v4 = vld [vmem:[%s199_s11 + $0x6] sm:$0x3] }
  0x5f   : > { %s433_s27 = sld [smem:[#allocation7 + $0x3]]  ;;  %s434_s22 = sld [smem:[#allocation7 + $0x80]] }
  0x60   : > { %s884_s20 = sld [smem:[#allocation8 + $0x1]]  ;;  %s437_s18 = sld [smem:[#allocation7 + $0x82]] }
  0x61   : > { %s436_s4 = sld [smem:[#allocation7 + $0x81]]  ;;  %s438_s19 = sld [smem:[#allocation7 + $0x83]] }
  0x62   : > { %s886_s21 = sld [smem:[#allocation7 + $0x100]]  ;;  %s888_s6 = sld [smem:[#allocation8 + $0x2]] }
  0x63   : > { %v236_v3 = vstv %s235_s25  ;;  %v242_v7 = vstv %s431_s30  ;;  %s442_s7 = sld [smem:[#allocation7 + $0x101]]  ;;  %s890_s9 = sld [smem:[#allocation7 + $0x102]] }
  0x64   : > { %v237_v5 = vmul.f32 %v236_v3, %v231_v0  ;;  %v239_v6 = vstv %s238_s29  ;;  %v246_v8 = vstv %s432_s28  ;;  %v243_v10 = vmul.f32 %v242_v7, %v232_v1  ;;  %s892_s10 = sld [smem:[#allocation7 + $0x103]]  ;;  %s450_s11 = smul.u32 6, %s868_s8 }
  0x65   : > { %v247_v11 = vmul.f32 %v246_v8, %v233_v2  ;;  %v250_v12 = vstv %s433_s27  ;;  %v255_v14 = vstv %s434_s22  ;;  %s451_s30 = smul.u32 96, %s679_s15  ;;  %p972_p4 = scmp.ne.s32.totalorder %s965_s23, 0 }
  0x66   : > { %v240_v9 = vadd.f32 %v239_v6, %v237_v5  ;;  %v251_v13 = vmul.f32 %v250_v12, %v234_v4  ;;  %v256_v16 = vmul.f32 %v255_v14, %v231_v0  ;;  %v258_v17 = vstv %s884_s20  ;;  %s230_s25 = scalar_lea.vmem [#allocation9], %s450_s11  ;;  %s295_s20 = scalar_lea.sflag [#allocation4], %s868_s8 }
  0x67   : > { %v261_v18 = vstv %s436_s4  ;;  %v265_v20 = vstv %s437_s18  ;;  %v269_v21 = vstv %s438_s19  ;;  %s309_s29 = sshll.u32 %s230_s25, 4  ;;  %s906_s22 = scalar_lea.hbm %s958_s3, %s451_s30  ;;  %s901_s29 = int_to_ptr.vmem [resolvable:$true] %s309_s29 }
  0x68   : > { %v244_v15 = vadd.f32 %v243_v10, %v240_v9  ;;  %v262_v19 = vmul.f32 %v261_v18, %v232_v1  ;;  %v259_v23 = vadd.f32 %v258_v17, %v256_v16  ;;  %v266_v24 = vmul.f32 %v265_v20, %v233_v2  ;;  %s597_s4 = scalar_lea.vmem %s901_s29, 96  ;;  %s694_s15 = smov [#allocation9]  }
  0x69   : > { %v270_v25 = vmul.f32 %v269_v21, %v234_v4  ;;  %v275_v26 = vstv %s886_s21  ;;  %v278_v27 = vstv %s888_s6  ;;  %v281_v28 = vstv %s442_s7  ;;  %p598_p13 = scmp.ne.s32.totalorder %s901_s29, %s597_s4  ;;  %s601_s18 = sshll.u32 %s694_s15, 4  ;;  %s602_s18 = int_to_ptr.vmem [resolvable:$false] %s601_s18 }
  0x6a   : > { %v248_v22 = vadd.f32 %v247_v11, %v244_v15  ;;  %v285_v29 = vstv %s890_s9  ;;  %v263_v31 = vadd.f32 %v262_v19, %v259_v23  ;;  %v276_v32 = vmul.f32 %v275_v26, %v231_v0  ;;  %s603_s19 = scalar_lea.vmem %s602_s18, 192  ;;  %p604_p10 = scmp.lt.s32.totalorder %s901_s29, %s602_s18 }
  0x6b   : > { %v282_v33 = vmul.f32 %v281_v28, %v232_v1  ;;  %v289_v34 = vstv %s892_s10  ;;  %v286_v37 = vmul.f32 %v285_v29, %v233_v2  ;;  %p599_p0 = pnand %p598_p13, %p972_p4  ;;  %p605_p11 = scmp.lt.s32.totalorder %s603_s19, %s597_s4 }
  0x6c   : > { %v252_v30 = vadd.f32 %v251_v13, %v248_v22  ;;  %v267_v35 = vadd.f32 %v266_v24, %v263_v31  ;;  %v279_v36 = vadd.f32 %v278_v27, %v276_v32  ;;  %v290_v40 = vmul.f32 %v289_v34, %v234_v4 }
  0x6d   : > { %p600_p5 = pneg %p599_p0  ;;  %p606_p3 = por %p605_p11, %p604_p10 }
  0x6e   : > { %253 = vst [vmem:[%s230_s25] sm:$0x3] %v252_v30  ;;  %v271_v38 = vadd.f32 %v270_v25, %v267_v35  ;;  %v283_v39 = vadd.f32 %v282_v33, %v279_v36 }
  0x6f   : > { %p607_p7 = pnand %p606_p3, %p600_p5 }
  0x70   : > { %439 = vst [vmem:[%s230_s25 + $0x2] sm:$0x3] %v271_v38  ;;  %v287_v41 = vadd.f32 %v286_v37, %v283_v39 }
  0x72   : > { %v291_v42 = vadd.f32 %v290_v40, %v287_v41 }
  0x74   : > { %445 = vst [vmem:[%s230_s25 + $0x4] sm:$0x3] %v291_v42 }
  0x75   : > { %610 = shalt.err (!%p607_p7)
}
  0x76   : > { %s611_s21 = scalar_lea.hbm %s906_s22, 96  ;;  %s615_s9 = scalar_lea.hbm %s958_s3, 192 }
  0x77   : > { %p612_p9 = scmp.ne.s32.totalorder %s906_s22, %s611_s21  ;;  %p616_p1 = scmp.lt.u32.totalorder %s906_s22, %s958_s3 }
  0x78   : > { %p617_p8 = scmp.lt.u32.totalorder %s615_s9, %s611_s21  ;;  %p619_p13 = scmp.lt.u32.totalorder %s611_s21, %s906_s22 }
  0x79   : > { %p613_p2 = pnand %p612_p9, %p972_p4 }
  0x7a   : > { %p618_p12 = por %p617_p8, %p616_p1 }
  0x7b   : > { %p614_p6 = pneg %p613_p2 }
  0x7c   : > { %p620_p0 = por %p619_p13, %p618_p12 }
  0x7e   : > { %p621_p5 = pnand %p620_p0, %p614_p6 }
  0x80   : > { %624 = shalt.err (!%p621_p5)
}
  0x81   : > { %s695_s25 = smov 32   ;;  %s696_s30 = smov 2  }
  0x82   : > { %462 = dma.vmem_to_hbm [thread:$0]  (%p972_p4), %s901_s29, 96, %s906_s22, %s295_s20, %s695_s25, %s695_s25, %s696_s30  }
  0x83 PF: > { %s324_s28 = sand.u32 1, %s667_s12   ;;  %p973_p10 = scmp.ne.s32.totalorder %s966_s24, 0 }
  0x84   : > { %p974_p11 = scmp.ge.s32.totalorder %s687_s17, 2  ;;  %s325_s27 = scalar_lea.sflag [#allocation4], %s324_s28 }
  0x86   : > { %p476_p3 = pnand %p974_p11, %p973_p10 }
  0x88   : > { %662 = dma.done.wait (!%p476_p3), %s325_s27, 96  }
  0x89   : > { %664 = vsyncadd (!%p476_p3), %s325_s27, 4294967200  ;;  %s21_s17 = sadd.s32 1, %s687_s17   ;;  %s975_s12 = smov %s671_s13 }
  0x8a   : > { %p18_p7 = scmp.ge.s32.totalorder %s21_s17, 4   ;;  %s976_s13 = smov %s675_s14 }
  0x8b   : > { %s977_s14 = smov %s833_s26  ;;  %s978_s15 = smov %s683_s16 }
  0x8c   : > { %s979_s16 = smov %s981_s5  ;;  %20 = sbr.rel (!%p18_p7) target bundleno = 8 (0x8), region = 89 }
  0x93   :  { %330 = vsyncpa [#allocation3], 1 }
  0x94   :  { %332 = vsyncpa [#allocation3 + $0x1], 1 }
  0x95   :  { %333 = vsyncpa [#allocation4], 1 }
  0x96   :  { %335 = vsyncpa [#allocation4 + $0x1], 1 }
  0x97   :  { %336 = vsyncpa [#allocation5], 1 }
  0x98   :  { %338 = vsyncpa [#allocation5 + $0x1], 1 }
  0x99   :  { %339 = vsyncpa [#allocation6], 1 }
  0x9a   :  { %341 = vsyncpa [#allocation6 + $0x1], 1 }

</bundles_post_ra>
